<compile_context>
chip_gen: v5e
topology: v5e:2x2
jax: 0.10.0
libtpu: 0.0.40
codegen_flags: <defaults>
</compile_context>

<pallas_src>
import functools

import jax
import jax.numpy as jnp
from jax.experimental import pallas as pl
from jax.experimental.pallas import tpu as pltpu


def _round_up(x, m):
    return ((x + m - 1) // m) * m


def _ceil_div(a, b):
    return -(-a // b)


# ----------------------------------------------------------------------------
# Kernels
# ----------------------------------------------------------------------------
def _norm_kernel(*refs, mode, eps, adanorm_scale, C, packed):
    """nowb / gradnorm / adanorm.

    packed=True : block is (tile, g*C); per-row (segmented) reductions are done
                  with an MXU matmul against the (g*C, g*C) block-diagonal ones
                  matrix m_ref, so outputs stay lane-dense.
    packed=False: block is (tile, C); reductions along axis=-1 (XLU).
    """
    if packed:
        x_ref, m_ref, o_ref = refs
    else:
        x_ref, o_ref = refs

    x = x_ref[...].astype(jnp.float32)

    if packed:
        m = m_ref[...]

        def seg_sum(v):
            # Segment-sum-and-broadcast over each C-wide lane segment (MXU).
            return jnp.dot(v, m, preferred_element_type=jnp.float32,
                           precision=jax.lax.Precision.HIGHEST)
    else:
        def seg_sum(v):
            return jnp.sum(v, axis=-1, keepdims=True)

    mean = seg_sum(x) * (1.0 / C)
    centered = x - mean
    # torch.std default = unbiased (N - 1).  NOTE: C == 1 gives 0/0 -> NaN,
    # matching torch.std of a single element.
    var_unbiased = seg_sum(centered * centered) / (C - 1.0)
    std = jnp.sqrt(var_unbiased)
    inv = pl.reciprocal(std + eps, approx=False)  # EUP; exact enough for 1e-4 tol

    if mode == "adanorm":
        # mean2 is ~0 (re-centering rounding noise); kept for exact torch parity.
        mean2 = seg_sum(centered) * (1.0 / C)
        # TODO(synk): torch detaches graNorm; forward values match, add
        # stop_gradient / custom_vjp if this is ever differentiated.
        gra = 0.1 * (centered - mean2) * inv
        out = (centered - centered * gra) * inv * adanorm_scale
    else:
        xn = centered * inv
        out = x + xn if mode == "gradnorm" else xn  # gradnorm: x.detach() + xn

    o_ref[...] = out.astype(o_ref.dtype)


def _topk_kernel(*refs, eps, C, packed):
    """mode == 'topk': clamp each row to [kth-smallest, kth-largest], then LN.

    packed=True : block is (tile, g*C).  Per-row thresholds arrive lane-packed
                  as (tile, g) and are expanded across each C-wide segment with
                  a (g, g*C) 0/1 matrix on the MXU; segmented mean/var use the
                  block-diagonal ones matrix.  weight/bias arrive tiled g times.
    packed=False: block is (tile, C); thresholds are (tile, 1).
    """
    if packed:
        x_ref, lo_ref, hi_ref, m_ref, e_ref, w_ref, b_ref, o_ref = refs
    else:
        x_ref, lo_ref, hi_ref, w_ref, b_ref, o_ref = refs

    x = x_ref[...].astype(jnp.float32)
    lo = lo_ref[...].astype(jnp.float32)
    hi = hi_ref[...].astype(jnp.float32)

    if packed:
        hp = jax.lax.Precision.HIGHEST
        m = m_ref[...]
        e = e_ref[...]
        # Broadcast each row's threshold across its C-wide lane segment (exact:
        # one nonzero per output column).
        lo = jnp.dot(lo, e, preferred_element_type=jnp.float32, precision=hp)
        hi = jnp.dot(hi, e, preferred_element_type=jnp.float32, precision=hp)

        def seg_sum(v):
            return jnp.dot(v, m, preferred_element_type=jnp.float32, precision=hp)
    else:
        def seg_sum(v):
            return jnp.sum(v, axis=-1, keepdims=True)

    xc = jnp.minimum(jnp.maximum(x, lo), hi)
    mean = seg_sum(xc) * (1.0 / C)
    diff = xc - mean
    var = seg_sum(diff * diff) * (1.0 / C)        # F.layer_norm: biased var
    xn = diff * jax.lax.rsqrt(var + eps)
    w = w_ref[...].astype(jnp.float32)
    b = b_ref[...].astype(jnp.float32)
    o_ref[...] = (xn * w + b).astype(o_ref.dtype)


# ----------------------------------------------------------------------------
# Wrapper
# ----------------------------------------------------------------------------
def _pick_row_tile(lane_w, itemsize, n_rows):
    # Target ~1 MiB of input per block (double-buffered in + out + f32 temps
    # stays comfortably under the 32 MiB VMEM limit on all generations, incl.
    # v7x's 64 MiB physical VMEM), capped at 2048 sublanes.
    cap = max(8, min(2048, ((1 << 20) // (lane_w * itemsize)) // 8 * 8))
    return min(cap, _round_up(max(n_rows, 1), 8))


def _pack_params(C, packed, g, lane_w):
    """Constant matrices for the lane-packed layout."""
    seg = jnp.arange(lane_w, dtype=jnp.int32) // C
    m = (seg[:, None] == seg[None, :]).astype(jnp.float32)          # (lane_w, lane_w)
    e = (jnp.arange(g, dtype=jnp.int32)[:, None] == seg[None, :]).astype(jnp.float32)
    return m, e                                                      # e: (g, lane_w)


def layer_norm_impl(
    x,
    mode,
    *,
    normalize_shape,
    weight=None,
    bias=None,
    adanorm_scale=1.0,
    sigma=0.5,
    eps=1e-5,
    row_tile=None,
):
    """Forward pass of LayerNormImpl. x has shape (T, B, C), C == normalize_shape."""
    if mode == "no_norm":
        return x

    T, B, C = x.shape
    assert C == normalize_shape
    rows = T * B
    x2 = x.reshape(rows, C)
    itemsize = jnp.dtype(x.dtype).itemsize

    cparams = pltpu.CompilerParams(
        dimension_semantics=("parallel",),     # shards the row grid on megacore
        vmem_limit_bytes=32 * 1024 * 1024,     # explicit; safe on v5e/v6e/v7x
    )

    # Lane-dense packing: fold g rows into the 128-lane axis when C is small.
    packed = (C < 128) and (128 % C == 0) and (C > 1)
    g = (128 // C) if packed else 1
    lane_w = g * C

    n_packed = _ceil_div(rows, g)
    rt = row_tile if row_tile is not None else _pick_row_tile(lane_w, itemsize, n_packed)
    rt = max(8, _round_up(rt, 8))
    n_packed_pad = _round_up(n_packed, rt)
    rows_pad = n_packed_pad * g
    x2p = jnp.pad(x2, ((0, rows_pad - rows), (0, 0))) if rows_pad != rows else x2
    grid = (n_packed_pad // rt,)
    row_spec = pl.BlockSpec((rt, lane_w), lambda i: (i, 0))

    def full_spec(shape):
        return pl.BlockSpec(shape, lambda i: (0, 0))

    if mode in ("nowb", "gradnorm", "adanorm"):
        xw = x2p.reshape(n_packed_pad, lane_w)   # no dtype change (bf16 stays bf16)
        in_specs = [row_spec]
        args = [xw]
        if packed:
            m, _ = _pack_params(C, packed, g, lane_w)
            in_specs.append(full_spec((lane_w, lane_w)))
            args.append(m)

        kern = functools.partial(
            _norm_kernel, mode=mode, eps=eps, adanorm_scale=adanorm_scale,
            C=C, packed=packed)
        outw = pl.pallas_call(
            kern,
            out_shape=jax.ShapeDtypeStruct((n_packed_pad, lane_w), x.dtype),
            grid=grid,
            in_specs=in_specs,
            out_specs=row_spec,
            compiler_params=cparams,
        )(*args)
        out2 = outw.reshape(rows_pad, C)[:rows]
        return out2.reshape(T, B, C)

    if mode == "topk":
        # Per-row clamp thresholds (glue): the torch scatter of the k-th
        # largest / k-th smallest value onto the top-k / bottom-k positions is
        # exactly a clamp to [kth-smallest, kth-largest].  Use lax.top_k in the
        # native dtype (no full sort, no fp32 staging copy).
        # TODO(synk): the top_k itself stays in XLA (no clean in-kernel
        # selection primitive); only the clamp + layer_norm run in Pallas.
        k = max(int(normalize_shape * sigma), 1)
        hi = jax.lax.top_k(x2p, k)[0][:, k - 1:k]      # k-th largest,  (rows_pad, 1)
        lo = -jax.lax.top_k(-x2p, k)[0][:, k - 1:k]    # k-th smallest, (rows_pad, 1)

        kern = functools.partial(_topk_kernel, eps=eps, C=C, packed=packed)

        if packed:
            xw = x2p.reshape(n_packed_pad, lane_w)
            lo_w = lo.reshape(n_packed_pad, g)
            hi_w = hi.reshape(n_packed_pad, g)
            m, e = _pack_params(C, packed, g, lane_w)
            w_w = jnp.tile(weight, g).reshape(1, lane_w)
            b_w = jnp.tile(bias, g).reshape(1, lane_w)
            thr_spec = pl.BlockSpec((rt, g), lambda i: (i, 0))
            outw = pl.pallas_call(
                kern,
                out_shape=jax.ShapeDtypeStruct((n_packed_pad, lane_w), x.dtype),
                grid=grid,
                in_specs=[row_spec, thr_spec, thr_spec,
                          full_spec((lane_w, lane_w)), full_spec((g, lane_w)),
                          full_spec((1, lane_w)), full_spec((1, lane_w))],
                out_specs=row_spec,
                compiler_params=cparams,
            )(xw, lo_w, hi_w, m, e, w_w, b_w)
            out2 = outw.reshape(rows_pad, C)[:rows]
        else:
            w2 = weight.reshape(1, C)
            b2 = bias.reshape(1, C)
            thr_spec = pl.BlockSpec((rt, 1), lambda i: (i, 0))
            out2 = pl.pallas_call(
                kern,
                out_shape=jax.ShapeDtypeStruct((rows_pad, C), x.dtype),
                grid=grid,
                in_specs=[row_spec, thr_spec, thr_spec,
                          full_spec((1, C)), full_spec((1, C))],
                out_specs=row_spec,
                compiler_params=cparams,
            )(x2p, lo, hi, w2, b2)[:rows]
        return out2.reshape(T, B, C)

    raise ValueError(f"unsupported mode: {mode}")


# ----------------------------------------------------------------------------
# Pure-JAX reference (mirrors the torch forward exactly) for verification
# ----------------------------------------------------------------------------
def _reference(x, mode, *, normalize_shape, weight, bias, adanorm_scale, sigma, eps):
    if mode == "no_norm":
        return x
    xf = x.astype(jnp.float32)
    n = xf.shape[-1]
    if mode == "topk":
        T, B, C = xf.shape
        x2 = xf.reshape(T * B, C)
        k = max(int(normalize_shape * sigma), 1)
        xs = jnp.sort(x2, axis=-1)
        hi = xs[:, C - k][:, None]
        lo = xs[:, k - 1][:, None]
        xc = jnp.clip(x2, lo, hi)
        mean = jnp.mean(xc, -1, keepdims=True)
        var = jnp.mean((xc - mean) ** 2, -1, keepdims=True)
        out = (xc - mean) / jnp.sqrt(var + eps) * weight[None, :] + bias[None, :]
        return out.reshape(T, B, C)
    mean = jnp.mean(xf, -1, keepdims=True)
    std = jnp.sqrt(jnp.sum((xf - mean) ** 2, -1, keepdims=True) / (n - 1))
    if mode == "adanorm":
        c = xf - mean
        m2 = jnp.mean(c, -1, keepdims=True)
        gra = 0.1 * (c - m2) / (std + eps)
        return (c - c * gra) / (std + eps) * adanorm_scale
    xn = (xf - mean) / (std + eps)
    if mode == "gradnorm":
        return xf + xn
    return xn  # nowb


# ----------------------------------------------------------------------------
if __name__ == "__main__":
    root_key = jax.random.PRNGKey(0)

    def run_case(T, B, C, key):
        x = jax.random.normal(key, (T, B, C), dtype=jnp.float32)
        weight = jnp.ones((C,), jnp.float32)   # reset_parameters(): ones / zeros
        bias = jnp.zeros((C,), jnp.float32)
        kwargs = dict(normalize_shape=C, weight=weight, bias=bias,
                      adanorm_scale=1.0, sigma=0.5, eps=1e-5)
        for mode in ["no_norm", "nowb", "gradnorm", "adanorm", "topk"]:
            out = jax.block_until_ready(layer_norm_impl(x, mode, **kwargs))
            ref = _reference(x, mode, **kwargs)
            assert out.shape == (T, B, C)
            assert jnp.allclose(out, ref, atol=1e-4, rtol=1e-4), \
                f"mismatch in mode {mode} for shape {(T, B, C)}"

    k1, k2 = jax.random.split(root_key)
    # seq=8, batch=2, hidden=32: exercises the lane-packed paths (g=4) + row padding.
    run_case(8, 2, 32, k1)
    # seq=5, batch=3, hidden=48: exercises the unpacked paths + non-multiple-of-8 rows.
    run_case(5, 3, 48, k2)

    print("KERNEL_OK")
</pallas_src>

<mosaic_0001>
module attributes {stable_mosaic.version = 11 : i64} {
  func.func @_norm_kernel(%arg0: i32, %arg1: memref<8x128xf32, #tpu.memory_space<vmem>>, %arg2: memref<128x128xf32, #tpu.memory_space<vmem>>, %arg3: memref<8x128xf32, #tpu.memory_space<vmem>>) attributes {dimension_semantics = [#tpu.dimension_semantics<parallel>], iteration_bounds = array<i64: 1>, scalar_prefetch = 0 : i64, scratch_operands = 0 : i64, tpu.core_type = #tpu.core_type<tc>, window_params = [{transform_indices = @transform_0, window_bounds = array<i64: 8, 128>}, {pipeline_mode = #tpu.pipeline_mode<synchronous>, transform_indices = @transform_1, window_bounds = array<i64: 128, 128>}, {transform_indices = @transform_2, window_bounds = array<i64: 8, 128>}]} {
    %c0 = arith.constant 0 : index
    %c0_0 = arith.constant 0 : index
    %0 = vector.load %arg1[%c0, %c0_0] : memref<8x128xf32, #tpu.memory_space<vmem>>, vector<8x128xf32>
    %c0_1 = arith.constant 0 : index
    %c0_2 = arith.constant 0 : index
    %1 = vector.load %arg2[%c0_1, %c0_2] : memref<128x128xf32, #tpu.memory_space<vmem>>, vector<128x128xf32>
    %cst = arith.constant dense<0.000000e+00> : vector<8x128xf32>
    %2 = tpu.matmul %0, %1, %cst {dimension_numbers = #tpu.dot_dimension_numbers<[1], [0], [0], [1], [0, 0, 1, 1], [], []>, precision = #tpu.contract_precision<fp32>} : vector<8x128xf32>, vector<128x128xf32>, vector<8x128xf32> -> vector<8x128xf32>
    %cst_3 = arith.constant 3.125000e-02 : f32
    %3 = vector.broadcast %cst_3 : f32 to vector<8x128xf32>
    %4 = arith.mulf %2, %3 : vector<8x128xf32>
    %5 = arith.subf %0, %4 : vector<8x128xf32>
    %6 = arith.mulf %5, %5 : vector<8x128xf32>
    %cst_4 = arith.constant dense<0.000000e+00> : vector<8x128xf32>
    %7 = tpu.matmul %6, %1, %cst_4 {dimension_numbers = #tpu.dot_dimension_numbers<[1], [0], [0], [1], [0, 0, 1, 1], [], []>, precision = #tpu.contract_precision<fp32>} : vector<8x128xf32>, vector<128x128xf32>, vector<8x128xf32> -> vector<8x128xf32>
    %cst_5 = arith.constant 3.100000e+01 : f32
    %8 = vector.broadcast %cst_5 : f32 to vector<8x128xf32>
    %9 = arith.divf %7, %8 : vector<8x128xf32>
    %10 = math.sqrt %9 : vector<8x128xf32>
    %cst_6 = arith.constant 9.99999974E-6 : f32
    %11 = vector.broadcast %cst_6 : f32 to vector<8x128xf32>
    %12 = arith.addf %10, %11 : vector<8x128xf32>
    %13 = tpu.reciprocal %12 : vector<8x128xf32> -> vector<8x128xf32>
    %14 = arith.mulf %5, %13 : vector<8x128xf32>
    %c0_7 = arith.constant 0 : index
    %c0_8 = arith.constant 0 : index
    %15 = vector.load %arg3[%c0_7, %c0_8] : memref<8x128xf32, #tpu.memory_space<vmem>>, vector<8x128xf32>
    tpu.vector_store %arg3[%c0_7, %c0_8], %14 {strides = array<i32>} : memref<8x128xf32, #tpu.memory_space<vmem>>, vector<8x128xf32>,
    return
  }
  func.func @transform_0(%arg0: i32) -> (i32, i32) {
    %c0_i32 = arith.constant 0 : i32
    %c0_i32_0 = arith.constant 0 : i32
    return %arg0, %c0_i32 : i32, i32
  }
  func.func @transform_1(%arg0: i32) -> (i32, i32) {
    %c0_i32 = arith.constant 0 : i32
    %c0_i32_0 = arith.constant 0 : i32
    %c0_i32_1 = arith.constant 0 : i32
    return %c0_i32, %c0_i32_0 : i32, i32
  }
  func.func @transform_2(%arg0: i32) -> (i32, i32) {
    %c0_i32 = arith.constant 0 : i32
    %c0_i32_0 = arith.constant 0 : i32
    return %arg0, %c0_i32 : i32, i32
  }
}

</mosaic_0001>

<bundles_post_ra>
// kernel: tpu_custom_call.1
= control target key start
LH: loop header
LB: loop body
LE: loop exit
PB: predicated region body
PF: predicated region fallthrough
CT: control target
= control target key end

     0   :  { %7 = vsyncpa [#allocation3], 0  ;;  %s1319_s0 = inlined_call_operand.hbm [shape: f32[8,128], index: 0, kind: input, shape index: {}]   ;;  %s1320_s1 = inlined_call_operand.hbm [shape: f32[128,128], index: 1, kind: input, shape index: {}]   ;;  %s1321_s2 = inlined_call_operand.hbm [shape: f32[8,128], index: 2, kind: output, shape index: {}]  }
   0x1   :  { %8 = vsyncpa [#allocation6], 0 }
   0x2   :  { %9 = vsyncpa [#allocation4], 0  ;;  %s15_s11 = sshll.u32 %s1319_s0, 4  ;;  %s889_s12 = smov [#allocation2]   ;;  %s16_s11 = int_to_ptr.hbm [resolvable:$true] %s15_s11 }
   0x3   :  { %s17_s13 = sshll.u32 %s889_s12, 4  ;;  %s25_s16 = sshll.u32 %s1320_s1, 4  ;;  %s18_s13 = int_to_ptr.vmem [resolvable:$true] %s17_s13  ;;  %s26_s16 = int_to_ptr.hbm [resolvable:$true] %s25_s16 }
   0x4   :  { %20 = dma.hbm_to_vmem [thread:$0]  %s16_s11, 128, %s18_s13, [#allocation3]  }
   0x5   :  { %s890_s17 = smov [#allocation5]   ;;  %s891_s19 = smov 128  }
   0x6   :  { %s27_s18 = sshll.u32 %s890_s17, 4  ;;  %s892_s20 = smov 8   ;;  %s28_s18 = int_to_ptr.vmem [resolvable:$true] %s27_s18 }
   0x7   :  { %33 = dma.hbm_to_vmem [thread:$0]  %s26_s16, 2048, %s28_s18, [#allocation6], %s891_s19, %s891_s19, %s892_s20  }
   0x8   :  { %883 = dma.done.wait [#allocation3], 128  }
   0x9   :  { %884 = vsyncadd [#allocation3], 4294967168 }
   0xa   :  { %885 = dma.done.wait [#allocation6], 2048  }
   0xb   :  { %886 = vsyncadd [#allocation6], 4294965248  ;;  %v58_v0 = vld [vmem:[#allocation5 + $0x78] sm:$0xff]  ;;  %v57_v1 = vld [vmem:[#allocation5 + $0x70] sm:$0xff]  ;;  %s894_s0 = smov [#allocation7]   ;;  %s788_s23 = sshll.u32 %s1321_s2, 4  ;;  %s789_s23 = int_to_ptr.hbm [resolvable:$true] %s788_s23 }
   0xc   :  { %v56_v2 = vld [vmem:[#allocation5 + $0x68] sm:$0xff]  ;;  %v916_v3 = vand.u32 4294901760, %v58_v0  ;;  %v918_v4 = vand.u32 4294901760, %v57_v1  ;;  %v55_v6 = vld [vmem:[#allocation5 + $0x60] sm:$0xff]  ;;  %v54_v7 = vld [vmem:[#allocation5 + $0x58] sm:$0xff]  ;;  %s786_s1 = sshll.u32 %s894_s0, 4  ;;  %s787_s1 = int_to_ptr.vmem [resolvable:$true] %s786_s1 }
   0xd   :  { %v920_v5 = vand.u32 4294901760, %v56_v2  ;;  %v53_v8 = vld [vmem:[#allocation5 + $0x50] sm:$0xff]  ;;  %v922_v9 = vand.u32 4294901760, %v55_v6  ;;  %v924_v10 = vand.u32 4294901760, %v54_v7  ;;  %v52_v12 = vld [vmem:[#allocation5 + $0x48] sm:$0xff]  ;;  %v51_v13 = vld [vmem:[#allocation5 + $0x40] sm:$0xff] }
   0xe   :  { %v926_v11 = vand.u32 4294901760, %v53_v8  ;;  %60 = vmatpush.msra.mxu0 %v916_v3  ;;  %v930_v14 = vsub.f32 %v58_v0, %v916_v3  ;;  %v933_v15 = vsub.f32 %v57_v1, %v918_v4  ;;  %v938_v17 = vand.u32 4294901760, %v52_v12  ;;  %v50_v18 = vld [vmem:[#allocation5 + $0x38] sm:$0xff]  ;;  %256 = vmatpush.msra.mxu3 %v916_v3  ;;  %v49_v26 = vld [vmem:[#allocation5 + $0x30] sm:$0xff]  ;;  %v48_v36 = vld [vmem:[#allocation5 + $0x28] sm:$0xff] }
   0xf   :  { %v936_v16 = vsub.f32 %v56_v2, %v920_v5  ;;  %v942_v19 = vsub.f32 %v55_v6, %v922_v9  ;;  %v945_v20 = vsub.f32 %v54_v7, %v924_v10  ;;  %v960_v25 = vand.u32 4294901760, %v51_v13  ;;  %v47_v42 = vld [vmem:[#allocation5 + $0x20] sm:$0xff]  ;;  %v46_v47 = vld [vmem:[#allocation5 + $0x18] sm:$0xff]  ;;  %v45_v55 = vld [vmem:[#allocation5 + $0x10] sm:$0xff] }
  0x10   :  { %v948_v21 = vsub.f32 %v53_v8, %v926_v11  ;;  %62 = vmatpush.msra.mxu0 %v918_v4  ;;  %v952_v22 = vand.u32 4294901760, %v930_v14  ;;  %v955_v23 = vand.u32 4294901760, %v933_v15  ;;  %203 = vmatpush.msra.mxu2 %v930_v14  ;;  %v966_v28 = vand.u32 4294901760, %v50_v18  ;;  %v44_v60 = vld [vmem:[#allocation5 + $0x8] sm:$0xff]  ;;  %v43_v1 = vld [vmem:[#allocation5] sm:$0xff]  ;;  %v1070_v7 = vld [vmem:[#allocation2] sm:$0xff] }
  0x11   :  { %v958_v24 = vand.u32 4294901760, %v936_v16  ;;  %v964_v27 = vand.u32 4294901760, %v942_v19  ;;  %v969_v29 = vsub.f32 %v52_v12, %v938_v17  ;;  %258 = vmatpush.msra.mxu3 %v918_v4  ;;  %v980_v33 = vand.u32 4294901760, %v945_v20  ;;  %1336 = vst [vmem:[#allocation17_spill] sm:$0xff] %v1070_v7 }
  0x12   :  { %64 = vmatpush.msra.mxu0 %v920_v5  ;;  %v103_v30 = vsub.f32 %v930_v14, %v952_v22  ;;  %v109_v31 = vsub.f32 %v933_v15, %v955_v23  ;;  %206 = vmatpush.msra.mxu2 %v933_v15  ;;  %v984_v34 = vand.u32 4294901760, %v948_v21  ;;  %v986_v35 = vand.u32 4294901760, %v49_v26 }
  0x13   :  { %v115_v32 = vsub.f32 %v936_v16, %v958_v24  ;;  %260 = vmatpush.msra.mxu3 %v920_v5  ;;  %v121_v39 = vsub.f32 %v942_v19, %v964_v27  ;;  %v997_v40 = vsub.f32 %v51_v13, %v960_v25  ;;  %v1001_v41 = vand.u32 4294901760, %v969_v29 }
  0x14   :  { %v989_v37 = vand.u32 4294901760, %v103_v30  ;;  %66 = vmatpush.msra.mxu0 %v922_v9  ;;  %v992_v38 = vand.u32 4294901760, %v109_v31  ;;  %209 = vmatpush.msra.mxu2 %v936_v16  ;;  %v127_v44 = vsub.f32 %v945_v20, %v980_v33  ;;  %v1010_v45 = vand.u32 4294901760, %v48_v36 }
  0x15   :  { %1330 = vst [vmem:[#allocation11_spill] sm:$0xff] %v997_v40  ;;  %262 = vmatpush.msra.mxu3 %v922_v9  ;;  %v1006_v43 = vand.u32 4294901760, %v115_v32  ;;  %v1013_v46 = vsub.f32 %v50_v18, %v966_v28  ;;  %v133_v48 = vsub.f32 %v948_v21, %v984_v34  ;;  %v1021_v49 = vand.u32 4294901760, %v121_v39 }
  0x16   :  { %105 = vmatpush.msra.mxu1 %v989_v37  ;;  %68 = vmatpush.msra.mxu0 %v924_v10  ;;  %v1024_v50 = vand.u32 4294901760, %v997_v40  ;;  %v1026_v51 = vand.u32 4294901760, %v47_v42  ;;  %v1029_v52 = vsub.f32 %v49_v26, %v986_v35  ;;  %v139_v53 = vsub.f32 %v969_v29, %v1001_v41 }
  0x17   :  { %1331 = vst [vmem:[#allocation12_spill] sm:$0xff] %v1013_v46  ;;  %212 = vmatpush.msra.mxu2 %v942_v19  ;;  %264 = vmatpush.msra.mxu3 %v924_v10  ;;  %v1033_v54 = vand.u32 4294901760, %v46_v47  ;;  %v1039_v56 = vand.u32 4294901760, %v127_v44  ;;  %v1042_v57 = vand.u32 4294901760, %v1013_v46  ;;  %v1045_v58 = vsub.f32 %v48_v36, %v1010_v45 }
  0x18   :  { %111 = vmatpush.msra.mxu1 %v992_v38  ;;  %70 = vmatpush.msra.mxu0 %v926_v11  ;;  %1332 = vst [vmem:[#allocation13_spill] sm:$0xff] %v1029_v52  ;;  %v1047_v59 = vand.u32 4294901760, %v133_v48  ;;  %v145_v61 = vsub.f32 %v997_v40, %v1024_v50  ;;  %v1056_v62 = vand.u32 4294901760, %v1029_v52  ;;  %v1058_v63 = vand.u32 4294901760, %v45_v55 }
  0x19   :  { %215 = vmatpush.msra.mxu2 %v945_v20  ;;  %266 = vmatpush.msra.mxu3 %v926_v11  ;;  %1333 = vst [vmem:[#allocation14_spill] sm:$0xff] %v1045_v58  ;;  %v1061_v0 = vsub.f32 %v47_v42, %v1026_v51  ;;  %v1063_v2 = vand.u32 4294901760, %v139_v53  ;;  %v1066_v6 = vsub.f32 %v46_v47, %v1033_v54  ;;  %v1077_v12 = vand.u32 4294901760, %v1045_v58 }
  0x1a   :  { %117 = vmatpush.msra.mxu1 %v1006_v43  ;;  %72 = vmatpush.msra.mxu0 %v938_v17  ;;  %v151_v8 = vsub.f32 %v1013_v46, %v1042_v57  ;;  %v1079_v13 = vand.u32 4294901760, %v44_v60  ;;  %v1082_v18 = vand.u32 4294901760, %v1070_v7  ;;  %v1084_v26 = vand.u32 4294901760, %v43_v1 }
  0x1b   :  { %218 = vmatpush.msra.mxu2 %v948_v21  ;;  %268 = vmatpush.msra.mxu3 %v938_v17  ;;  %1334 = vst [vmem:[#allocation15_spill] sm:$0xff] %v1061_v0  ;;  %v1090_v30 = vand.u32 4294901760, %v145_v61  ;;  %v157_v31 = vsub.f32 %v1029_v52, %v1056_v62  ;;  %v1095_v32 = vand.u32 4294901760, %v1061_v0  ;;  %v1098_v36 = vsub.f32 %v45_v55, %v1058_v63 }
  0x1c   :  { %123 = vmatpush.msra.mxu1 %v1021_v49  ;;  %74 = vmatpush.msra.mxu0 %v960_v25  ;;  %1335 = vst [vmem:[#allocation16_spill] sm:$0xff] %v1066_v6  ;;  %v1101_v39 = vand.u32 4294901760, %v1066_v6  ;;  %v1107_v42 = vand.u32 4294901760, %v151_v8  ;;  %v163_v44 = vsub.f32 %v1045_v58, %v1077_v12  ;;  %v1112_v47 = vsub.f32 %v44_v60, %v1079_v13 }
  0x1d   :  { %221 = vmatpush.msra.mxu2 %v969_v29  ;;  %270 = vmatpush.msra.mxu3 %v960_v25  ;;  %1337 = vst [vmem:[#allocation18_spill] sm:$0xff] %v1098_v36  ;;  %v92_v48 = vsub.f32 %v1070_v7, %v1082_v18  ;;  %v1120_v53 = vand.u32 4294901760, %v157_v31  ;;  %v169_v55 = vsub.f32 %v1061_v0, %v1095_v32  ;;  %v1125_v61 = vand.u32 4294901760, %v1098_v36 }
  0x1e   :  { %129 = vmatpush.msra.mxu1 %v1039_v56  ;;  %76 = vmatpush.msra.mxu0 %v966_v28  ;;  %v1128_v60 = vsub.f32 %v43_v1, %v1084_v26  ;;  %v1134_v8 = vand.u32 4294901760, %v163_v44  ;;  %v175_v31 = vsub.f32 %v1066_v6, %v1101_v39  ;;  %v1139_v7 = vand.u32 4294901760, %v1112_v47 }
  0x1f   :  { %224 = vmatpush.msra.mxu2 %v997_v40  ;;  %272 = vmatpush.msra.mxu3 %v966_v28  ;;  %v1145_v1 = vand.u32 4294901760, %v169_v55  ;;  %v181_v44 = vsub.f32 %v1098_v36, %v1125_v61 }
  0x20   :  { %135 = vmatpush.msra.mxu1 %v1047_v59  ;;  %78 = vmatpush.msra.mxu0 %v986_v35  ;;  %v187_v55 = vsub.f32 %v1112_v47, %v1139_v7 }
  0x21   :  { %227 = vmatpush.msra.mxu2 %v1013_v46  ;;  %274 = vmatpush.msra.mxu3 %v986_v35 }
  0x22   :  { %141 = vmatpush.msra.mxu1 %v1063_v2  ;;  %80 = vmatpush.msra.mxu0 %v1010_v45 }
  0x23   :  { %230 = vmatpush.msra.mxu2 %v1029_v52  ;;  %276 = vmatpush.msra.mxu3 %v1010_v45  ;;  %v93_v52 = vand.u32 4294901760, %v92_v48 }
  0x24   :  { %147 = vmatpush.msra.mxu1 %v1090_v30  ;;  %82 = vmatpush.msra.mxu0 %v1026_v51 }
  0x25   :  { %233 = vmatpush.msra.mxu2 %v1045_v58  ;;  %278 = vmatpush.msra.mxu3 %v1026_v51  ;;  %v1150_v58 = vand.u32 4294901760, %v1128_v60  ;;  %v94_v46 = vsub.f32 %v92_v48, %v93_v52 }
  0x26   :  { %153 = vmatpush.msra.mxu1 %v1107_v42  ;;  %84 = vmatpush.msra.mxu0 %v1033_v54 }
  0x27   :  { %236 = vmatpush.msra.mxu2 %v1061_v0  ;;  %280 = vmatpush.msra.mxu3 %v1033_v54  ;;  %v1156_v0 = vand.u32 4294901760, %v175_v31  ;;  %v193_v40 = vsub.f32 %v1128_v60, %v1150_v58  ;;  %v1171_v31 = vand.u32 4294901760, %v187_v55 }
  0x28   :  { %159 = vmatpush.msra.mxu1 %v1120_v53  ;;  %86 = vmatpush.msra.mxu0 %v1058_v63 }
  0x29   :  { %239 = vmatpush.msra.mxu2 %v1066_v6  ;;  %282 = vmatpush.msra.mxu3 %v1058_v63  ;;  %v1164_v6 = vand.u32 4294901760, %v181_v44  ;;  %v1177_v44 = vand.u32 4294901760, %v193_v40 }
  0x2a   :  { %165 = vmatpush.msra.mxu1 %v1134_v8  ;;  %88 = vmatpush.msra.mxu0 %v1079_v13 }
  0x2b   :  { %242 = vmatpush.msra.mxu2 %v1098_v36  ;;  %284 = vmatpush.msra.mxu3 %v1079_v13  ;;  %v95_v36 = vand.u32 4294901760, %v94_v46 }
  0x2c   :  { %171 = vmatpush.msra.mxu1 %v1145_v1  ;;  %90 = vmatpush.msra.mxu0 %v1084_v26 }
  0x2d   :  { %245 = vmatpush.msra.mxu2 %v1112_v47  ;;  %286 = vmatpush.msra.mxu3 %v1084_v26 }
  0x2e   :  { %297 = vmatpush.msrb.mxu0 %v952_v22  ;;  %177 = vmatpush.msra.mxu1 %v1156_v0 }
  0x2f   :  { %248 = vmatpush.msra.mxu2 %v1128_v60  ;;  %290 = vmatmul.f32.vlgmr.msra.gmra.mxu3 %v93_v52 }
  0x30   :  { %301 = vmatpush.msrb.mxu0 %v955_v23  ;;  %183 = vmatpush.msra.mxu1 %v1164_v6 }
  0x31   :  { %251 = vmatmul.f32.vlgmr.msra.gmra.mxu2 %v92_v48  ;;  %96 = vmatmul.f32.vlgmr.msra.gmra.mxu0 %v95_v36 }
  0x32   :  { %305 = vmatpush.msrb.mxu0 %v958_v24  ;;  %189 = vmatpush.msra.mxu1 %v1171_v31 }
  0x33   :  { %449 = vmatpush.msrb.mxu3 %v989_v37  ;;  %404 = vmatpush.msrb.mxu2 %v916_v3 }
  0x34   :  { %309 = vmatpush.msrb.mxu0 %v964_v27  ;;  %195 = vmatpush.msra.mxu1 %v1177_v44 }
  0x35   :  { %197 = vmatmul.f32.vlgmr.msra.gmra.mxu1 %v1082_v18  ;;  %455 = vmatpush.msrb.mxu3 %v992_v38 }
  0x36   :  { %364 = vmatpush.msrb.mxu1 %v916_v3  ;;  %313 = vmatpush.msrb.mxu0 %v980_v33 }
  0x37   :  { %461 = vmatpush.msrb.mxu3 %v1006_v43  ;;  %406 = vmatpush.msrb.mxu2 %v918_v4  ;;  %v893_v43 = vmov 31.0  }
  0x38   :  { %366 = vmatpush.msrb.mxu1 %v918_v4  ;;  %317 = vmatpush.msrb.mxu0 %v984_v34  ;;  %805 = vrcp.f32 %v893_v43 }
  0x39   :  { %467 = vmatpush.msrb.mxu3 %v1021_v49  ;;  %408 = vmatpush.msrb.mxu2 %v920_v5 }
  0x3a   :  { %368 = vmatpush.msrb.mxu1 %v920_v5  ;;  %321 = vmatpush.msrb.mxu0 %v1001_v41 }
  0x3b   :  { %473 = vmatpush.msrb.mxu3 %v1039_v56  ;;  %410 = vmatpush.msrb.mxu2 %v922_v9 }
  0x3c   :  { %370 = vmatpush.msrb.mxu1 %v922_v9  ;;  %325 = vmatpush.msrb.mxu0 %v1024_v50 }
  0x3d   :  { %479 = vmatpush.msrb.mxu3 %v1047_v59  ;;  %412 = vmatpush.msrb.mxu2 %v924_v10 }
  0x3e   :  { %372 = vmatpush.msrb.mxu1 %v924_v10  ;;  %329 = vmatpush.msrb.mxu0 %v1042_v57 }
  0x3f   :  { %485 = vmatpush.msrb.mxu3 %v1063_v2  ;;  %414 = vmatpush.msrb.mxu2 %v926_v11 }
  0x40   :  { %374 = vmatpush.msrb.mxu1 %v926_v11  ;;  %333 = vmatpush.msrb.mxu0 %v1056_v62 }
  0x41   :  { %491 = vmatpush.msrb.mxu3 %v1090_v30  ;;  %416 = vmatpush.msrb.mxu2 %v938_v17 }
  0x42   :  { %376 = vmatpush.msrb.mxu1 %v938_v17  ;;  %337 = vmatpush.msrb.mxu0 %v1077_v12 }
  0x43   :  { %497 = vmatpush.msrb.mxu3 %v1107_v42  ;;  %418 = vmatpush.msrb.mxu2 %v960_v25 }
  0x44   :  { %378 = vmatpush.msrb.mxu1 %v960_v25  ;;  %341 = vmatpush.msrb.mxu0 %v1095_v32 }
  0x45   :  { %503 = vmatpush.msrb.mxu3 %v1120_v53  ;;  %420 = vmatpush.msrb.mxu2 %v966_v28 }
  0x46   :  { %380 = vmatpush.msrb.mxu1 %v966_v28  ;;  %345 = vmatpush.msrb.mxu0 %v1101_v39 }
  0x47   :  { %509 = vmatpush.msrb.mxu3 %v1134_v8  ;;  %422 = vmatpush.msrb.mxu2 %v986_v35 }
  0x48   :  { %382 = vmatpush.msrb.mxu1 %v986_v35  ;;  %349 = vmatpush.msrb.mxu0 %v1125_v61 }
  0x49   :  { %515 = vmatpush.msrb.mxu3 %v1145_v1  ;;  %424 = vmatpush.msrb.mxu2 %v1010_v45 }
  0x4a   :  { %384 = vmatpush.msrb.mxu1 %v1010_v45  ;;  %353 = vmatpush.msrb.mxu0 %v1139_v7 }
  0x4b   :  { %521 = vmatpush.msrb.mxu3 %v1156_v0  ;;  %426 = vmatpush.msrb.mxu2 %v1026_v51 }
  0x4c   :  { %386 = vmatpush.msrb.mxu1 %v1026_v51  ;;  %357 = vmatpush.msrb.mxu0 %v1150_v58 }
  0x4d   :  { %359 = vmatmul.f32.vlgmr.msrb.gmra.mxu0 %v1082_v18  ;;  %527 = vmatpush.msrb.mxu3 %v1164_v6 }
  0x4e   :  { %388 = vmatpush.msrb.mxu1 %v1033_v54  ;;  %547 = vmatpush.msra.mxu0 %v930_v14  ;;  %v1344_v14 = vld [vmem:[#allocation18_spill] sm:$0xff] }
  0x4f   :  { %533 = vmatpush.msrb.mxu3 %v1171_v31  ;;  %428 = vmatpush.msrb.mxu2 %v1033_v54 }
  0x50   :  { %390 = vmatpush.msrb.mxu1 %v1058_v63  ;;  %550 = vmatpush.msra.mxu0 %v933_v15 }
  0x51   :  { %539 = vmatpush.msrb.mxu3 %v1177_v44  ;;  %430 = vmatpush.msrb.mxu2 %v1058_v63 }
  0x52   :  { %392 = vmatpush.msrb.mxu1 %v1079_v13  ;;  %553 = vmatpush.msra.mxu0 %v936_v16 }
  0x53   :  { %708 = vmatpush.msra.mxu3 %v916_v3  ;;  %432 = vmatpush.msrb.mxu2 %v1079_v13 }
  0x54   :  { %394 = vmatpush.msrb.mxu1 %v1084_v26  ;;  %556 = vmatpush.msra.mxu0 %v942_v19 }
  0x55   :  { %396 = vmatmul.f32.vlgmr.msrb.gmra.mxu1 %v1082_v18  ;;  %710 = vmatpush.msra.mxu3 %v918_v4 }
  0x56   :  { %600 = vmatpush.msra.mxu1 %v916_v3  ;;  %559 = vmatpush.msra.mxu0 %v945_v20  ;;  %v1338_v3 = vld [vmem:[#allocation11_spill] sm:$0xff] }
  0x57   :  { %712 = vmatpush.msra.mxu3 %v920_v5  ;;  %434 = vmatpush.msrb.mxu2 %v1084_v26 }
  0x58   :  { %602 = vmatpush.msra.mxu1 %v918_v4  ;;  %562 = vmatpush.msra.mxu0 %v948_v21  ;;  %v1339_v4 = vld [vmem:[#allocation12_spill] sm:$0xff] }
  0x59   :  { %714 = vmatpush.msra.mxu3 %v922_v9  ;;  %641 = vmatpush.msra.mxu2 %v952_v22 }
  0x5a   :  { %604 = vmatpush.msra.mxu1 %v920_v5  ;;  %565 = vmatpush.msra.mxu0 %v969_v29  ;;  %v1340_v5 = vld [vmem:[#allocation13_spill] sm:$0xff] }
  0x5b   :  { %716 = vmatpush.msra.mxu3 %v924_v10  ;;  %645 = vmatpush.msra.mxu2 %v955_v23  ;;  %v1345_v29 = vld [vmem:[#allocation17_spill] sm:$0xff] }
  0x5c   :  { %606 = vmatpush.msra.mxu1 %v922_v9  ;;  %568 = vmatpush.msra.mxu0 %v1338_v3  ;;  %v1341_v9 = vld [vmem:[#allocation14_spill] sm:$0xff] }
  0x5d   :  { %718 = vmatpush.msra.mxu3 %v926_v11  ;;  %649 = vmatpush.msra.mxu2 %v958_v24 }
  0x5e   :  { %608 = vmatpush.msra.mxu1 %v924_v10  ;;  %571 = vmatpush.msra.mxu0 %v1339_v4  ;;  %v1342_v10 = vld [vmem:[#allocation15_spill] sm:$0xff] }
  0x5f   :  { %720 = vmatpush.msra.mxu3 %v938_v17  ;;  %653 = vmatpush.msra.mxu2 %v964_v27 }
  0x60   :  { %610 = vmatpush.msra.mxu1 %v926_v11  ;;  %574 = vmatpush.msra.mxu0 %v1340_v5  ;;  %v1343_v11 = vld [vmem:[#allocation16_spill] sm:$0xff] }
  0x61   :  { %722 = vmatpush.msra.mxu3 %v960_v25  ;;  %657 = vmatpush.msra.mxu2 %v980_v33 }
  0x62   :  { %612 = vmatpush.msra.mxu1 %v938_v17  ;;  %577 = vmatpush.msra.mxu0 %v1341_v9 }
  0x63   :  { %724 = vmatpush.msra.mxu3 %v966_v28  ;;  %661 = vmatpush.msra.mxu2 %v984_v34 }
  0x64   :  { %614 = vmatpush.msra.mxu1 %v960_v25  ;;  %580 = vmatpush.msra.mxu0 %v1342_v10 }
  0x65   :  { %726 = vmatpush.msra.mxu3 %v986_v35  ;;  %665 = vmatpush.msra.mxu2 %v1001_v41 }
  0x66   :  { %616 = vmatpush.msra.mxu1 %v966_v28  ;;  %583 = vmatpush.msra.mxu0 %v1343_v11 }
  0x67   :  { %728 = vmatpush.msra.mxu3 %v1010_v45  ;;  %669 = vmatpush.msra.mxu2 %v1024_v50 }
  0x68   :  { %618 = vmatpush.msra.mxu1 %v986_v35  ;;  %586 = vmatpush.msra.mxu0 %v1344_v14 }
  0x69   :  { %730 = vmatpush.msra.mxu3 %v1026_v51  ;;  %673 = vmatpush.msra.mxu2 %v1042_v57 }
  0x6a   :  { %620 = vmatpush.msra.mxu1 %v1010_v45  ;;  %589 = vmatpush.msra.mxu0 %v1112_v47  ;;  %v806_v45 = vpop.eup %805 }
  0x6b   :  { %732 = vmatpush.msra.mxu3 %v1033_v54  ;;  %677 = vmatpush.msra.mxu2 %v1056_v62  ;;  %v745_v46 = vmul.f32 31.0, %v806_v45  ;;  %vm749_vm0 = vweird.f32 %v806_v45 }
  0x6c   :  { %622 = vmatpush.msra.mxu1 %v1026_v51  ;;  %592 = vmatpush.msra.mxu0 %v1128_v60 }
  0x6d   :  { %734 = vmatpush.msra.mxu3 %v1058_v63  ;;  %681 = vmatpush.msra.mxu2 %v1077_v12  ;;  %v746_v49 = vsub.f32 1.0, %v745_v46 }
  0x6e   :  { %624 = vmatpush.msra.mxu1 %v1033_v54 }
  0x6f   :  { %736 = vmatpush.msra.mxu3 %v1079_v13  ;;  %685 = vmatpush.msra.mxu2 %v1095_v32  ;;  %v747_v56 = vmul.f32 %v806_v45, %v746_v49 }
  0x70   :  { %626 = vmatpush.msra.mxu1 %v1058_v63 }
  0x71   :  { %738 = vmatpush.msra.mxu3 %v1084_v26  ;;  %689 = vmatpush.msra.mxu2 %v1101_v39  ;;  %v748_v59 = vadd.f32 %v806_v45, %v747_v56 }
  0x72   :  { %628 = vmatpush.msra.mxu1 %v1079_v13 }
  0x73   :  { %693 = vmatpush.msra.mxu2 %v1125_v61  ;;  %v750_v6 = vsel %vm749_vm0, %v806_v45, %v748_v59 }
  0x74   :  { %630 = vmatpush.msra.mxu1 %v1084_v26 }
  0x75   :  { %697 = vmatpush.msra.mxu2 %v1139_v7 }
  0x77   :  { %701 = vmatpush.msra.mxu2 %v1150_v58 }
  0xae   :  { %v97_v16 = vpop.f32.mrf.mxu0 }
  0xb2   :  { %v198_v15 = vpop.f32.mrf.mxu1  ;;  %v291_v21 = vpop.f32.mrf.mxu3 }
  0xb3   :  { %v199_v17 = vadd.f32 %v198_v15, %v97_v16 }
  0xb4   :  { %v252_v19 = vpop.f32.mrf.mxu2 }
  0xb5   :  { %v253_v20 = vadd.f32 %v252_v19, %v199_v17 }
  0xb7   :  { %v292_v22 = vadd.f32 %v291_v21, %v253_v20 }
  0xca   :  { %v360_v23 = vpop.f32.mrf.mxu0 }
  0xcb   :  { %v361_v24 = vadd.f32 %v360_v23, %v292_v22 }
  0xd2   :  { %v397_v25 = vpop.f32.mrf.mxu1 }
  0xd3   :  { %v398_v27 = vadd.f32 %v397_v25, %v361_v24 }
  0xd5   :  { %v400_v28 = vmul.f32 0.03125, %v398_v27 }
  0xd7   :  { %v1311_v33 = vsub.f32 %v1345_v29, %v400_v28 }
  0xd9   :  { %v402_v34 = vmul.f32 %v1311_v33, %v1311_v33 }
  0xdb   :  { %v435_v35 = vand.u32 4294901760, %v402_v34 }
  0xdd   :  { %v436_v37 = vsub.f32 %v402_v34, %v435_v35  ;;  %541 = vmatmul.f32.vlgmr.msrb.gmra.mxu3 %v435_v35 }
  0xdf   :  { %595 = vmatmul.f32.vlgmr.msra.gmra.mxu0 %v436_v37  ;;  %v437_v38 = vand.u32 4294901760, %v436_v37 }
  0xe1   :  { %634 = vmatmul.f32.vlgmr.msra.gmra.mxu1 %v437_v38  ;;  %v438_v40 = vsub.f32 %v436_v37, %v437_v38 }
  0xe3   :  { %v439_v41 = vand.u32 4294901760, %v438_v40 }
  0xe5   :  { %440 = vmatmul.f32.vlgmr.msrb.gmra.mxu2 %v439_v41  ;;  %740 = vmatmul.f32.vlgmr.msra.gmra.mxu3 %v435_v35 }
  0xed   :  { %703 = vmatmul.f32.vlgmr.msra.gmra.mxu2 %v435_v35 }
 0x15c   :  { %v596_v54 = vpop.f32.mrf.mxu0 }
 0x15e   :  { %v635_v58 = vpop.f32.mrf.mxu1 }
 0x160   :  { %v542_v50 = vpop.f32.mrf.mxu3 }
 0x168   :  { %v441_v51 = vpop.f32.mrf.mxu2  ;;  %v741_v2 = vpop.f32.mrf.mxu3 }
 0x169   :  { %v543_v52 = vadd.f32 %v542_v50, %v441_v51 }
 0x16b   :  { %v597_v57 = vadd.f32 %v596_v54, %v543_v52 }
 0x16d   :  { %v636_v62 = vadd.f32 %v635_v58, %v597_v57 }
 0x170   :  { %v704_v63 = vpop.f32.mrf.mxu2 }
 0x171   :  { %v705_v0 = vadd.f32 %v704_v63, %v636_v62 }
 0x173   :  { %v742_v7 = vadd.f32 %v741_v2, %v705_v0 }
 0x175   :  { %v751_v12 = vmul.f32 %v750_v6, %v742_v7 }
 0x177   :  { %807 = vrsqrt.f32 %v751_v12  ;;  %vm759_vm1 = vcmp.eq.f32.partialorder %v751_v12, inf  ;;  %v762_v42 = vand.u32 2147483648, %v751_v12  ;;  %vm761_vm2 = vcmp.eq.f32.partialorder %v751_v12, 0.0 }
 0x17d   :  { %v808_v13 = vpop.eup %807 }
 0x17e   :  { %v753_v18 = vmul.f32 %v808_v13, %v751_v12 }
 0x180   :  { %v754_v26 = vmul.f32 %v808_v13, %v753_v18 }
 0x182   :  { %v755_v30 = vmul.f32 0.5, %v754_v26 }
 0x184   :  { %v756_v32 = vsub.f32 1.5, %v755_v30 }
 0x186   :  { %v757_v36 = vmul.f32 %v808_v13, %v756_v32 }
 0x188   :  { %v758_v39 = vmul.f32 %v757_v36, %v751_v12 }
 0x18a   :  { %v760_v47 = vsel %vm759_vm1, %v751_v12, %v758_v39 }
 0x18b   :  { %v763_v48 = vsel %vm761_vm2, %v762_v42, %v760_v47 }
 0x18c   :  { %v764_v53 = vadd.f32 1e-05, %v763_v48 }
 0x18e   :  { %809 = vrcp.f32 %v764_v53  ;;  %v776_v1 = vand.u32 2147483648, %v764_v53  ;;  %v774_v31 = vand.u32 2147483647, %v764_v53  ;;  %vm770_vm4 = vweird.f32 %v764_v53 }
 0x190   :  { %v777_v3 = vor.u32 1.1754944e-38, %v776_v1  ;;  %vm775_vm6 = vcmp.eq.f32.partialorder %v774_v31, 8.507059e+37 }
 0x194   :  { %v810_v61 = vpop.eup %809 }
 0x195   :  { %v766_v60 = vmul.f32 %v810_v61, %v764_v53  ;;  %vm771_vm3 = vweird.f32 %v810_v61 }
 0x196   :  { %vm772_vm5 = vmor %vm770_vm4, %vm771_vm3 }
 0x197   :  { %v767_v8 = vsub.f32 1.0, %v766_v60 }
 0x199   :  { %v768_v55 = vmul.f32 %v810_v61, %v767_v8 }
 0x19b   :  { %v769_v44 = vadd.f32 %v810_v61, %v768_v55 }
 0x19d   :  { %v773_v4 = vsel %vm772_vm5, %v810_v61, %v769_v44 }
 0x19e   :  { %v778_v5 = vsel %vm775_vm6, %v777_v3, %v773_v4 }
 0x19f   :  { %v779_v9 = vmul.f32 %v778_v5, %v1311_v33 }
 0x1a1   :  { %780 = vst [vmem:[#allocation7] sm:$0xff] %v779_v9 }
 0x1a2   :  { %791 = dma.vmem_to_hbm [thread:$0]  %s787_s1, 128, %s789_s23, [#allocation4]  }
 0x1a3   :  { %887 = dma.done.wait [#allocation4], 128  }
 0x1a4   :  { %888 = vsyncadd [#allocation4], 4294967168 }
 0x1a5   :  { %796 = vsyncpa [#allocation3], 1 }
 0x1a6   :  { %797 = vsyncpa [#allocation6], 1 }
 0x1a7   :  { %798 = vsyncpa [#allocation4], 1 }

</bundles_post_ra>
